<compile_context>
chip_gen: v7x
topology: tpu7x:2x2x1
jax: 0.10.0
libtpu: 0.0.40
codegen_flags: <defaults>
</compile_context>

<pallas_src>
import functools

import jax
import jax.numpy as jnp
from jax.experimental import pallas as pl
from jax.experimental.pallas import tpu as pltpu


def _time2vec_kernel(tau_ref, p_ref, out_ref, *, kdim):
    # tau_ref: (R, kdim)   p_ref: (kdim+2, LANES)   out_ref: (R, LANES)
    tau = tau_ref[...]                         # (R, kdim) f32
    w_exp = p_ref[0:kdim, :]                   # (kdim, LANES) block-diag [w|w0]
    b = p_ref[kdim:kdim + 1, :]                # (1, LANES)  [b|b0] tiled
    mask = p_ref[kdim + 1:kdim + 2, :]         # (1, LANES)  1.0 periodic, 0.0 linear

    if kdim == 1:
        # Rank-1 case (no folding): broadcast FMA on the VPU.
        vals = tau * w_exp + b
    else:
        # Lane expansion + affine on the MXU (idle otherwise); K padded to 8.
        vals = jnp.dot(tau, w_exp, preferred_element_type=jnp.float32) + b

    # Compare is a single (1, LANES) vreg per step; per-vreg cost is one vsel.
    out = jnp.where(mask > 0.0, jnp.sin(vals), vals)
    out_ref[...] = out.astype(out_ref.dtype)


def time2vec(tau, w0, b0, w, b, *, out_dtype=jnp.float32):
    """tau: (B, T). Returns (B, T, embed_dim) = cat([sin(tau*w+b), tau*w0+b0], -1)."""
    B, T = tau.shape
    D = w.shape[1] + 1                         # embed_dim
    N = B * T

    # Lane folding: pack FOLD rows per 128-lane slab when D divides 128.
    if D <= 128 and 128 % D == 0:
        fold = 128 // D
    else:
        fold = 1                               # fallback: one row per slab
    lanes = fold * D
    kdim = 8 if fold > 1 else 1                # pad K to a full sublane group

    # --- Tile sizing: ~8 grid steps (>=4 per TC on v7x), 8-aligned, <=2048 rows.
    n_rows = pl.cdiv(N, fold)                  # folded rows
    tile_r = ((pl.cdiv(n_rows, 8) + 7) // 8) * 8
    tile_r = max(8, min(2048, tile_r))
    n_steps = pl.cdiv(n_rows, tile_r)
    n_rows_p = n_steps * tile_r
    n_pad = n_rows_p * fold                    # padded element count (>= N)

    # --- Compact tau input: (n_rows_p, kdim), zero-padded tail rows / K columns.
    tau_flat = tau.reshape(N).astype(jnp.float32)
    if n_pad != N:
        tau_flat = jnp.pad(tau_flat, (0, n_pad - N))
    tau_f = tau_flat.reshape(n_rows_p, fold)
    if kdim != fold:
        tau_f = jnp.pad(tau_f, ((0, 0), (0, kdim - fold)))

    # --- Resident params block: block-diag W expansion, bias row, periodic mask.
    w_row = jnp.concatenate([w, w0], axis=1).astype(jnp.float32)      # (1, D)
    b_row = jnp.concatenate([b, b0], axis=1).astype(jnp.float32)      # (1, D)
    mask_row = jnp.concatenate(
        [jnp.ones((1, D - 1), jnp.float32), jnp.zeros((1, 1), jnp.float32)], axis=1)
    if fold > 1:
        w_exp = jnp.kron(jnp.eye(fold, dtype=jnp.float32), w_row)     # (fold, lanes)
        w_exp = jnp.pad(w_exp, ((0, kdim - fold), (0, 0)))            # (kdim, lanes)
    else:
        w_exp = w_row                                                 # (1, D)
    params = jnp.concatenate(
        [w_exp, jnp.tile(b_row, (1, fold)), jnp.tile(mask_row, (1, fold))], axis=0)

    kernel = functools.partial(_time2vec_kernel, kdim=kdim)
    out = pl.pallas_call(
        kernel,
        out_shape=jax.ShapeDtypeStruct((n_rows_p, lanes), out_dtype),
        grid=(n_steps,),
        in_specs=[
            pl.BlockSpec((tile_r, kdim), lambda i: (i, 0)),
            pl.BlockSpec((kdim + 2, lanes), lambda i: (0, 0)),        # resident params
        ],
        out_specs=pl.BlockSpec((tile_r, lanes), lambda i: (i, 0)),
        compiler_params=pltpu.CompilerParams(
            dimension_semantics=("parallel",),                        # dual-TC on v7x
            vmem_limit_bytes=32 * 1024 * 1024,
        ),
    )(tau_f, params)

    # Unfold: (n_rows_p, fold*D) -> (n_rows_p*fold, D) is a bitcast reshape.
    out = out.reshape(n_rows_p * fold, D)
    if n_pad != N:                             # slice only when padding was added
        out = out[:N]
    return out.reshape(B, T, D)


def time2vec_ref(tau, w0, b0, w, b):
    """Pure-JAX reference matching the PyTorch forward exactly."""
    tau_e = tau[..., None]                           # (B, T, 1)
    v1 = jnp.sin(jnp.matmul(tau_e, w) + b)           # (B, T, D-1)
    v2 = jnp.matmul(tau_e, w0) + b0                  # (B, T, 1)
    return jnp.concatenate([v1, v2], axis=-1)


if __name__ == "__main__":
    embed_dim = 32
    B, T = 2, 8

    key = jax.random.PRNGKey(0)
    k_w0, k_b0, k_w, k_b, k_tau, k_tau2, k_tau3 = jax.random.split(key, 7)

    # Deterministic "torch.randn"-like parameter init (shapes from __init__).
    w0 = jax.random.normal(k_w0, (1, 1), dtype=jnp.float32)
    b0 = jax.random.normal(k_b0, (1, 1), dtype=jnp.float32)
    w = jax.random.normal(k_w, (1, embed_dim - 1), dtype=jnp.float32)
    b = jax.random.normal(k_b, (1, embed_dim - 1), dtype=jnp.float32)

    # Small demo shape.
    tau = jax.random.normal(k_tau, (B, T), dtype=jnp.float32)
    out = jax.block_until_ready(time2vec(tau, w0, b0, w, b))
    ref = time2vec_ref(tau, w0, b0, w, b)
    assert out.shape == (B, T, embed_dim), out.shape
    assert jnp.allclose(out, ref, atol=1e-5, rtol=1e-5), "mismatch vs reference (small)"

    # Multi-step grid with row padding (N=5000 -> grid=(8,), one-tile-bounded pad).
    B2, T2 = 5, 1000
    tau2 = jax.random.normal(k_tau2, (B2, T2), dtype=jnp.float32)
    out2 = jax.block_until_ready(time2vec(tau2, w0, b0, w, b))
    ref2 = time2vec_ref(tau2, w0, b0, w, b)
    assert out2.shape == (B2, T2, embed_dim), out2.shape
    assert jnp.allclose(out2, ref2, atol=1e-5, rtol=1e-5), "mismatch vs reference (large)"

    # Shape where padding vanishes entirely (no epilogue slice): N=512.
    B3, T3 = 2, 256
    tau3 = jax.random.normal(k_tau3, (B3, T3), dtype=jnp.float32)
    out3 = jax.block_until_ready(time2vec(tau3, w0, b0, w, b))
    ref3 = time2vec_ref(tau3, w0, b0, w, b)
    assert out3.shape == (B3, T3, embed_dim), out3.shape
    assert jnp.allclose(out3, ref3, atol=1e-5, rtol=1e-5), "mismatch vs reference (exact)"

    print("KERNEL_OK")
</pallas_src>

<mosaic_0001>
module attributes {stable_mosaic.version = 11 : i64} {
  func.func @_time2vec_kernel(%arg0: i32, %arg1: memref<8x8xf32, #tpu.memory_space<vmem>>, %arg2: memref<10x128xf32, #tpu.memory_space<vmem>>, %arg3: memref<8x128xf32, #tpu.memory_space<vmem>>) attributes {dimension_semantics = [#tpu.dimension_semantics<parallel>], iteration_bounds = array<i64: 1>, scalar_prefetch = 0 : i64, scratch_operands = 0 : i64, tpu.core_type = #tpu.core_type<tc>, window_params = [{transform_indices = @transform_0, window_bounds = array<i64: 8, 8>}, {pipeline_mode = #tpu.pipeline_mode<synchronous>, transform_indices = @transform_1, window_bounds = array<i64: 10, 128>}, {transform_indices = @transform_2, window_bounds = array<i64: 8, 128>}]} {
    %c0 = arith.constant 0 : index
    %c0_0 = arith.constant 0 : index
    %0 = vector.load %arg1[%c0, %c0_0] : memref<8x8xf32, #tpu.memory_space<vmem>>, vector<8x8xf32>
    %c0_1 = arith.constant 0 : index
    %c0_2 = arith.constant 0 : index
    %1 = vector.load %arg2[%c0_1, %c0_2] : memref<10x128xf32, #tpu.memory_space<vmem>>, vector<8x128xf32>
    %c8 = arith.constant 8 : index
    %c0_3 = arith.constant 0 : index
    %2 = vector.load %arg2[%c8, %c0_3] : memref<10x128xf32, #tpu.memory_space<vmem>>, vector<1x128xf32>
    %c9 = arith.constant 9 : index
    %c0_4 = arith.constant 0 : index
    %3 = vector.load %arg2[%c9, %c0_4] : memref<10x128xf32, #tpu.memory_space<vmem>>, vector<1x128xf32>
    %cst = arith.constant dense<0.000000e+00> : vector<8x128xf32>
    %4 = tpu.matmul %0, %1, %cst {dimension_numbers = #tpu.dot_dimension_numbers<[1], [0], [0], [1], [0, 0, 1, 1], [], []>} : vector<8x8xf32>, vector<8x128xf32>, vector<8x128xf32> -> vector<8x128xf32>
    %5 = vector.broadcast %2 : vector<1x128xf32> to vector<8x128xf32>
    %6 = arith.addf %4, %5 : vector<8x128xf32>
    %cst_5 = arith.constant 0.000000e+00 : f32
    %7 = vector.broadcast %cst_5 : f32 to vector<1x128xf32>
    %8 = arith.cmpf ogt, %3, %7 : vector<1x128xf32>
    %9 = math.sin %6 : vector<8x128xf32>
    %10 = vector.shape_cast %8 : vector<1x128xi1> to vector<1x128xi1>
    %11 = vector.broadcast %10 : vector<1x128xi1> to vector<8x128xi1>
    %12 = arith.select %11, %9, %6 : vector<8x128xi1>, vector<8x128xf32>
    %c0_6 = arith.constant 0 : index
    %c0_7 = arith.constant 0 : index
    %13 = vector.load %arg3[%c0_6, %c0_7] : memref<8x128xf32, #tpu.memory_space<vmem>>, vector<8x128xf32>
    tpu.vector_store %arg3[%c0_6, %c0_7], %12 {strides = array<i32>} : memref<8x128xf32, #tpu.memory_space<vmem>>, vector<8x128xf32>,
    return
  }
  func.func @transform_0(%arg0: i32) -> (i32, i32) {
    %c0_i32 = arith.constant 0 : i32
    %c0_i32_0 = arith.constant 0 : i32
    return %arg0, %c0_i32 : i32, i32
  }
  func.func @transform_1(%arg0: i32) -> (i32, i32) {
    %c0_i32 = arith.constant 0 : i32
    %c0_i32_0 = arith.constant 0 : i32
    %c0_i32_1 = arith.constant 0 : i32
    return %c0_i32, %c0_i32_0 : i32, i32
  }
  func.func @transform_2(%arg0: i32) -> (i32, i32) {
    %c0_i32 = arith.constant 0 : i32
    %c0_i32_0 = arith.constant 0 : i32
    return %arg0, %c0_i32 : i32, i32
  }
}

</mosaic_0001>

<bundles_post_ra>
// kernel: tpu_custom_call.1
= control target key start
LH: loop header
LB: loop body
LE: loop exit
PB: predicated region body
PF: predicated region fallthrough
CT: control target
= control target key end

     0   :  { %7 = vsyncpa [#allocation3], 0  ;;  %s450_s0 = inlined_call_operand.hbm [shape: f32[8,8], index: 0, kind: input, shape index: {}]   ;;  %s451_s1 = inlined_call_operand.hbm [shape: f32[10,128], index: 1, kind: input, shape index: {}]   ;;  %s452_s2 = inlined_call_operand.hbm [shape: f32[8,128], index: 2, kind: output, shape index: {}]  }
   0x1   :  { %8 = vsyncpa [#allocation6], 0 }
   0x2   :  { %9 = vsyncpa [#allocation4], 0  ;;  %s356_s9 = smov [#allocation2]   ;;  %s357_s11 = smov [#allocation5]  }
   0x3   :  { %s16_s10 = sshll.u32 %s356_s9, 4  ;;  %s25_s12 = sshll.u32 %s357_s11, 4  ;;  %s17_s10 = int_to_ptr.vmem [resolvable:$true] %s16_s10  ;;  %s385_s12 = int_to_ptr.vmem [resolvable:$true] %s25_s12 }
   0x4   :  { %s284_s15 = scalar_lea.hbm %s450_s0, 128 }
   0x5   :  { %p285_p0 = scmp.ne.s32.totalorder %s450_s0, %s284_s15  ;;  %p288_p1 = scmp.lt.u32.totalorder %s284_s15, %s450_s0 }
   0x7   :  { %p290_p2 = pnand %p288_p1, %p285_p0 }
   0x9   :  { %293 = shalt.err (!%p290_p2)
}
   0xa   :  { %s294_s20 = scalar_lea.vmem %s17_s10, 128  ;;  %p299_p4 = scmp.lt.s32.totalorder %s17_s10, %s17_s10 }
   0xb   :  { %p295_p3 = scmp.ne.s32.totalorder %s17_s10, %s294_s20  ;;  %p300_p5 = scmp.lt.s32.totalorder %s294_s20, %s294_s20 }
   0xd   :  { %p301_p6 = por %p300_p5, %p299_p4 }
   0xf   :  { %p302_p7 = pnand %p301_p6, %p295_p3 }
  0x11   :  { %305 = shalt.err (!%p302_p7)
}
  0x12   :  { %19 = dma.hbm_to_vmem [thread:$0]  %s450_s0, 128, %s17_s10, [#allocation3]  }
  0x13   :  { %s306_s25 = scalar_lea.hbm %s451_s1, 256 }
  0x14   :  { %p307_p8 = scmp.ne.s32.totalorder %s451_s1, %s306_s25  ;;  %p310_p9 = scmp.lt.u32.totalorder %s306_s25, %s451_s1 }
  0x16   :  { %p312_p10 = pnand %p310_p9, %p307_p8 }
  0x18   :  { %315 = shalt.err (!%p312_p10)
}
  0x19   :  { %s316_s30 = scalar_lea.vmem %s385_s12, 256  ;;  %p321_p12 = scmp.lt.s32.totalorder %s385_s12, %s385_s12 }
  0x1a   :  { %p317_p11 = scmp.ne.s32.totalorder %s385_s12, %s316_s30  ;;  %p322_p13 = scmp.lt.s32.totalorder %s316_s30, %s316_s30 }
  0x1c   :  { %p323_p0 = por %p322_p13, %p321_p12 }
  0x1e   :  { %p324_p1 = pnand %p323_p0, %p317_p11 }
  0x20   :  { %327 = shalt.err (!%p324_p1)
}
  0x21   :  { %s358_s0 = smov 128   ;;  %s359_s3 = smov 8  }
  0x22   :  { %31 = dma.hbm_to_vmem [thread:$0]  %s451_s1, 256, %s385_s12, [#allocation6], %s358_s0, %s358_s0, %s359_s3  }
  0x23   :  { %350 = dma.done.wait [#allocation3], 128  }
  0x24   :  { %351 = vsyncadd [#allocation3], 4294967168 }
  0x25   :  { %352 = dma.done.wait [#allocation6], 256  }
  0x26   :  { %353 = vsyncadd [#allocation6], 4294967040  ;;  %v360_v0 = vmov 0.0   ;;  %vm361_vm0 = vmmov 0   ;;  %vm46_vm1 = vcmask 64512   ;;  %v39_v1 = vld [vmem:[#allocation5] sm:$0xff] }
  0x27   :  { %257 = vmatprep.subr.mxu0 %v360_v0  ;;  %259 = vmatprep.mubr.msk.f32.mxu0 %vm361_vm0, %v360_v0  ;;  %v38_v2 = vld [vmem:[#allocation2] sm:$0xff]  ;;  %v249_v3 = vld [vmem:[#allocation5 + $0x8] ss:$0 sm:$0xff]  ;;  %v362_v18 = vmov 2102212464   ;;  %s369_s1 = smov [#allocation7]  }
  0x28   :  { %258 = vmatpush3.msra.mxu0 %v39_v1  ;;  %v363_v20 = vmov 920167782   ;;  %v364_v24 = vmov 1326507024   ;;  %v365_v26 = vmov 683565275  }
  0x29   :  { %260 = vmatmul.mubr.msk.f32.vlgmr.msra.gmra.mrb[0].mxu0 %vm46_vm1, %v38_v2  ;;  %v366_v28 = vmov 2475754826   ;;  %v367_v31 = vmov 2131351028   ;;  %s239_s6 = sshll.u32 %s369_s1, 4  ;;  %s240_s6 = int_to_ptr.vmem [resolvable:$true] %s239_s6 }
  0x2a   :  { %s328_s7 = scalar_lea.vmem %s240_s6, 128  ;;  %p333_p3 = scmp.lt.s32.totalorder %s240_s6, %s240_s6 }
  0x2b   :  { %p329_p2 = scmp.ne.s32.totalorder %s240_s6, %s328_s7  ;;  %p334_p4 = scmp.lt.s32.totalorder %s328_s7, %s328_s7 }
  0x2d   :  { %p335_p5 = por %p334_p4, %p333_p3 }
  0x2f   :  { %p336_p6 = pnand %p335_p5, %p329_p2 }
  0xfc   :  { %v116_v4 = vpop.f32.mrb[0].mxu0 }
  0xfd   :  { %v416_v5 = vadd.f32 %v249_v3, %v116_v4  ;;  %v261_v6 = vpop.f32.mrb[1].mxu0 }
  0xff   :  { %v124_v7 = vand.u32 2139095040, %v416_v5  ;;  %v121_v8 = vand.u32 2147483647, %v416_v5  ;;  %vm123_vm9 = vcmp.lt.s32.totalorder %v416_v5, 0  ;;  %vm213_vm0 = vweird.f32 %v416_v5 }
 0x101   :  { %v125_v9 = vshrl.u32 %v124_v7, 23  ;;  %v128_v11 = vand.u32 8388607, %v121_v8  ;;  %vm122_vm10 = vcmp.le.f32.partialorder %v121_v8, 0.7853982 }
 0x103   :  { %v251_v10 = vadd.s32 4294967169, %v125_v9  ;;  %v129_v14 = vor.u32 8388608, %v128_v11 }
 0x105   :  { %v131_v12 = vadd.s32 1, %v251_v10  ;;  %v169_v22 = vshll.u32 %v129_v14, 8 }
 0x107   :  { %vm132_vm2 = vcmp.gt.s32.totalorder %v131_v12, 0 }
 0x108   :  { %v133_v13 = vsel %vm132_vm2, %v131_v12, 0 }
 0x109   :  { %v135_v15 = vand.u32 31, %v133_v13  ;;  %v134_v16 = vshrl.u32 %v133_v13, 5 }
 0x10b   :  { %v136_v17 = vsub.s32 32, %v135_v15  ;;  %v147_v19 = vshll.u32 %v362_v18, %v135_v15  ;;  %v150_v21 = vshll.u32 %v363_v20, %v135_v15  ;;  %v138_v27 = vshll.u32 %v365_v26, %v135_v15 }
 0x10c   :  { %v141_v30 = vshll.u32 %v366_v28, %v135_v15  ;;  %v144_v33 = vshll.u32 %v367_v31, %v135_v15  ;;  %vm156_vm3 = vcmp.lt.s32.totalorder %v134_v16, 4  ;;  %vm153_vm4 = vcmp.lt.s32.totalorder %v134_v16, 1 }
 0x10d   :  { %v148_v23 = vshrl.u32 %v363_v20, %v136_v17  ;;  %v151_v25 = vshrl.u32 %v364_v24, %v136_v17  ;;  %v139_v29 = vshrl.u32 %v366_v28, %v136_v17  ;;  %v142_v32 = vshrl.u32 %v367_v31, %v136_v17 }
 0x10e   :  { %v145_v34 = vshrl.u32 %v362_v18, %v136_v17  ;;  %v137_v38 = vshrl.u32 %v365_v26, %v136_v17  ;;  %vm154_vm5 = vcmp.lt.s32.totalorder %v134_v16, 2  ;;  %vm155_vm6 = vcmp.lt.s32.totalorder %v134_v16, 3  ;;  %v41_v26 = vld [vmem:[#allocation5 + $0x9] sm:$0x1] }
 0x10f   :  { %v149_v35 = vor.u32 %v148_v23, %v147_v19  ;;  %v152_v36 = vor.u32 %v151_v25, %v150_v21  ;;  %v140_v37 = vor.u32 %v139_v29, %v138_v27  ;;  %v143_v39 = vor.u32 %v142_v32, %v141_v30 }
 0x110   :  { %v146_v40 = vor.u32 %v145_v34, %v144_v33  ;;  %v226_v24 = vlaneseq  ;;  %vm120_vm11 = vcmp.gt.f32.partialorder %v41_v26, 0.0  ;;  %v368_v31 = vmov 0  }
 0x111   :  { %v162_v41 = vsel %vm156_vm3, %v149_v35, 920167782  ;;  %v166_v42 = vsel %vm156_vm3, %v152_v36, 1326507024  ;;  %v161_v44 = vsel %vm153_vm4, %v140_v37, %v143_v39  ;;  %v157_v47 = vsel %vm153_vm4, %v137_v38, %v140_v37 }
 0x112   :  { %v158_v43 = vsel %vm156_vm3, %v146_v40, 2102212464  ;;  %v163_v45 = vsel %vm155_vm6, %v146_v40, %v162_v41  ;;  %v165_v46 = vsel %vm153_vm4, %v143_v39, %v146_v40  ;;  %v167_v50 = vsel %vm155_vm6, %v149_v35, %v166_v42 }
 0x113   :  { %v159_v48 = vsel %vm155_vm6, %v143_v39, %v158_v43  ;;  %v164_v49 = vsel %vm154_vm5, %v161_v44, %v163_v45  ;;  %v168_v51 = vsel %vm154_vm5, %v165_v46, %v167_v50  ;;  %v227_v28 = vshrl.u32 %v226_v24, 7 }
 0x114   :  { %v422_v52 = vmul.u32.u64.low %v169_v22, %v164_v49  ;;  %v423_v53 = vmul.u32.u64.high %v169_v22, %v164_v49, %v422_v52  ;;  %v425_v54 = vmul.u32.u64.low %v169_v22, %v168_v51  ;;  %v426_v55 = vmul.u32.u64.high %v169_v22, %v168_v51, %v425_v54 }
 0x115   :  { %v160_v56 = vsel %vm154_vm5, %v157_v47, %v159_v48  ;;  %v228_v30 = vsub.s32 0, %v227_v28  ;;  %v225_v32 = vsel %vm120_vm11, 1, %v368_v31 }
 0x116   :  { %v179_v57 = vadd.s32 1, %v423_v53  ;;  %v176_v58 = vmul.u32 %v169_v22, %v160_v56  ;;  %vm178_vm7 = vc.u32 %v426_v55, %v422_v52  ;;  %v177_v7 = vadd.s32 %v422_v52, %v426_v55 }
 0x117   :  { %v229_v35 = vrot.slane %v225_v32, %v228_v30 }
 0x118   :  { %v180_v59 = vsel %vm178_vm7, %v179_v57, %v423_v53 }
 0x119   :  { %v181_v60 = vadd.s32 %v180_v59, %v176_v58  ;;  %vm230_vm15 = vcmp.eq.s32.totalorder %v229_v35, 1 }
 0x11b   :  { %v182_v61 = vadd.s32 536870912, %v181_v60 }
 0x11d   :  { %v183_v62 = vshrl.u32 %v182_v61, 30 }
 0x11f   :  { %v184_v63 = vshll.u32 %v183_v62, 30  ;;  %v207_v20 = vsub.s32 4, %v183_v62 }
 0x121   :  { %v185_v0 = vsub.s32 %v181_v60, %v184_v63  ;;  %v208_v23 = vsel %vm123_vm9, %v207_v20, %v183_v62 }
 0x122   :  { %v210_v27 = vsel %vm122_vm10, 0, %v208_v23 }
 0x123   :  { %v187_v1 = vsub.s32 0, %v185_v0  ;;  %v214_v29 = vadd.s32 3, %v210_v27 }
 0x125   :  { %v252_v2 = vmin.u32 %v187_v1, %v185_v0  ;;  %v215_v33 = vand.u32 3, %v214_v29 }
 0x127   :  { %v189_v3 = vclz %v252_v2  ;;  %vm220_vm12 = vcmp.eq.s32.totalorder %v215_v33, 2  ;;  %vm217_vm13 = vcmp.eq.s32.totalorder %v215_v33, 0  ;;  %vm216_vm14 = vcmp.lt.s32.totalorder %v215_v33, 2 }
 0x129   :  { %v253_v4 = vadd.s32 4294967294, %v189_v3 }
 0x12b   :  { %vm254_vm8 = vcmp.lt.s32.totalorder %v253_v4, 0 }
 0x12c   :  { %v192_v6 = vsel %vm254_vm8, 0, %v253_v4 }
 0x12d   :  { %v193_v9 = vsub.s32 32, %v192_v6  ;;  %v197_v10 = vsub.s32 4294967266, %v192_v6  ;;  %v194_v11 = vshll.u32 %v185_v0, %v192_v6 }
 0x12f   :  { %v195_v12 = vshrl.u32 %v177_v7, %v193_v9  ;;  %v198_v13 = vadd.s32 127, %v197_v10 }
 0x131   :  { %v196_v14 = vor.u32 %v195_v12, %v194_v11  ;;  %v199_v15 = vshll.u32 %v198_v13, 23 }
 0x133   :  { %v200_v16 = vor.u32 4788187, %v199_v15  ;;  %v203_v18 = vcvt.s32.f32 %v196_v14 }
 0x135   :  { %v201_v17 = vand.u32 2147483647, %v200_v16 }
 0x137   :  { %v204_v19 = vmul.f32 %v203_v18, %v201_v17 }
 0x139   :  { %v205_v21 = vxor.u32 2147483648, %v204_v19 }
 0x13b   :  { %v206_v22 = vsel %vm123_vm9, %v205_v21, %v204_v19 }
 0x13c   :  { %v209_v25 = vsel %vm122_vm10, %v416_v5, %v206_v22 }
 0x13d   :  { %280 = vcosq.f32 %v209_v25 }
 0x13e   :  { %282 = vsinq.f32 %v209_v25 }
 0x147   :  { %v281_v34 = vpop.eup %280 }
 0x148   :  { %v283_v36 = vpop.eup %282  ;;  %v221_v8 = vxor.u32 2147483648, %v281_v34 }
 0x149   :  { %v218_v37 = vxor.u32 2147483648, %v283_v36 }
 0x14a   :  { %v222_v38 = vsel %vm220_vm12, %v221_v8, %v283_v36 }
 0x14b   :  { %v219_v39 = vsel %vm217_vm13, %v281_v34, %v218_v37 }
 0x14c   :  { %v223_v40 = vsel %vm216_vm14, %v219_v39, %v222_v38 }
 0x14d   :  { %v224_v41 = vsel %vm213_vm0, nan, %v223_v40 }
 0x14e   :  { %v231_v42 = vsel %vm230_vm15, %v224_v41, %v416_v5 }
 0x14f   :  { %232 = vst [vmem:[#allocation7] sm:$0xff] %v231_v42 }
 0x150   :  { %339 = shalt.err (!%p336_p6)
}
 0x151   :  { %s340_s10 = scalar_lea.hbm %s452_s2, 128 }
 0x152   :  { %p341_p7 = scmp.ne.s32.totalorder %s452_s2, %s340_s10  ;;  %p344_p8 = scmp.lt.u32.totalorder %s340_s10, %s452_s2 }
 0x154   :  { %p346_p9 = pnand %p344_p8, %p341_p7 }
 0x156   :  { %349 = shalt.err (!%p346_p9)
}
 0x157   :  { %242 = dma.vmem_to_hbm [thread:$0]  %s240_s6, 128, %s452_s2, [#allocation4]  }
 0x158   :  { %354 = dma.done.wait [#allocation4], 128  }
 0x159   :  { %355 = vsyncadd [#allocation4], 4294967168 }
 0x15a   :  { %246 = vsyncpa [#allocation3], 1 }
 0x15b   :  { %247 = vsyncpa [#allocation6], 1 }
 0x15c   :  { %248 = vsyncpa [#allocation4], 1 }

</bundles_post_ra>
